<compile_context>
chip_gen: v7x
topology: tpu7x:2x2x1
jax: 0.10.0
libtpu: 0.0.40
codegen_flags: <defaults>
</compile_context>

<pallas_src>
import jax
import jax.numpy as jnp
from jax.experimental import pallas as pl
from jax.experimental.pallas import tpu as pltpu


def rnn_kernel(x_ref, hc0_ref, cc0_ref, wx_ref, bcomb_ref, wblk_ref,
               wfc_ref, bfc_ref, out_ref):
    L = x_ref.shape[0]
    HH = hc0_ref.shape[1]          # 2*H (combined [layer0 | layer1] width)
    H = HH // 2

    # Recurrence-invariant loads (small: fused weight is 8 bf16 vregs).
    wblk = wblk_ref[...]           # (2H, 8H) bf16, block-diag + gate-interleaved
    bcomb = bcomb_ref[...]         # (1, 8H)  f32, [b0i,b1i,b0f,b1f,b0o,b1o,b0g,b1g]

    # Batched layer-0 input projection + combined biases, already in the
    # interleaved gate layout.  Layer-1 columns of wx are zero, so xgb[s]'s
    # layer-1 slots hold exactly b1.
    x_bf = x_ref[...].astype(jnp.bfloat16)
    xgb = jnp.dot(x_bf, wx_ref[...], preferred_element_type=jnp.float32) + bcomb

    hc = hc0_ref[...]              # (1, 2H) = [h_layer0 | h_layer1]
    cc = cc0_ref[...]              # (1, 2H) = [c_layer0 | c_layer1]

    lane = jax.lax.broadcasted_iota(jnp.int32, (1, HH), 1)
    keep_l0 = lane < H             # lanes belonging to layer 0

    def fused_cell(g, c_prev):
        # g: (1, 8H) fused gates for (layer-0 step s, layer-1 step s-1),
        # layout [i0,i1,f0,f1,o0,o1,g0,g1]; c_prev: (1, 2H) = [c0 | c1].
        i = jax.nn.sigmoid(g[:, 0:2 * H])
        f = jax.nn.sigmoid(g[:, 2 * H:4 * H])
        o = jax.nn.sigmoid(g[:, 4 * H:6 * H])
        gg = jnp.tanh(g[:, 6 * H:8 * H])
        c_new = f * c_prev + i * gg
        h_new = o * jnp.tanh(c_new)
        return h_new, c_new           # (1,2H) each; h_new is next stage's LHS

    def fused_stage(hc_in, cc_in, add):
        g = jnp.dot(hc_in.astype(jnp.bfloat16), wblk,
                    preferred_element_type=jnp.float32) + add
        return fused_cell(g, cc_in)

    # ---- Stage 0 (prologue): only the layer-0 half is meaningful; keep the
    # layer-1 half of the state at its initial value via a lane select (no
    # lane movement, no special-cased slicing).
    h_new, c_new = fused_stage(hc, cc, xgb[0:1, :])
    hc = jnp.where(keep_l0, h_new, hc)
    cc = jnp.where(keep_l0, c_new, cc)

    # ---- Stages 1..L-1: layer-0 step s and layer-1 step s-1, stacked. ----
    for s in range(1, L):
        hc, cc = fused_stage(hc, cc, xgb[s:s + 1, :])

    # ---- Stage L (epilogue): layer-1 step L-1 only. ----
    g = jnp.dot(hc.astype(jnp.bfloat16), wblk,
                preferred_element_type=jnp.float32) + bcomb
    i1 = jax.nn.sigmoid(g[:, H:2 * H])
    f1 = jax.nn.sigmoid(g[:, 3 * H:4 * H])
    o1 = jax.nn.sigmoid(g[:, 5 * H:6 * H])
    gg1 = jnp.tanh(g[:, 7 * H:8 * H])
    c1 = f1 * cc[:, H:2 * H] + i1 * gg1
    h1 = o1 * jnp.tanh(c1)

    # ---- FC head: hn.view(1,-1) == [h0_final | h1_final]; weight split so no
    # lane concat is needed.  Eval dropout scale already folded into wfc.
    wfc = wfc_ref[...]                       # (2H, 2) f32
    out = (jnp.dot(hc[:, 0:H], wfc[0:H, :], preferred_element_type=jnp.float32)
           + jnp.dot(h1, wfc[H:2 * H, :], preferred_element_type=jnp.float32)
           + bfc_ref[...])
    out_ref[...] = out


def rnn_forward(x, kparams, stage='eval'):
    """Pallas implementation of RNN.forward(x, stage). Returns shape (2,)."""
    # Eval path: module does x *= (1 - dropout); folded into 'wfc_eval'.
    # TODO(synk): 'train'-stage Bernoulli dropout mask (with 1/(1-p) scaling)
    # is not implemented; only the eval path is reproduced here.
    wfc = kparams['wfc_eval'] if stage != 'train' else kparams['wfc_train']

    vmem = pl.BlockSpec(memory_space=pltpu.MemorySpace.VMEM)
    out = pl.pallas_call(
        rnn_kernel,
        out_shape=jax.ShapeDtypeStruct((1, 2), jnp.float32),
        in_specs=[vmem] * 8,
        out_specs=vmem,
    )(x, kparams['hc0'], kparams['cc0'], kparams['wx'], kparams['bcomb'],
      kparams['wblk'], wfc, kparams['bfc'])
    return out[0]


def init_params(key, kdim, hdim):
    """Deterministic raw parameters matching the nn.Module's shapes."""
    keys = jax.random.split(key, 12)
    bound = 1.0 / float(hdim) ** 0.5
    fc_bound = 1.0 / float(2 * hdim) ** 0.5

    def u(k, shape, b):
        return jax.random.uniform(k, shape, jnp.float32, -b, b)

    return dict(
        h0=jax.random.normal(keys[0], (2, hdim), jnp.float32),
        c0=jax.random.normal(keys[1], (2, hdim), jnp.float32),
        wih0=u(keys[2], (4 * hdim, kdim), bound),
        whh0=u(keys[3], (4 * hdim, hdim), bound),
        bih0=u(keys[4], (4 * hdim,), bound),
        bhh0=u(keys[5], (4 * hdim,), bound),
        wih1=u(keys[6], (4 * hdim, hdim), bound),
        whh1=u(keys[7], (4 * hdim, hdim), bound),
        bih1=u(keys[8], (4 * hdim,), bound),
        bhh1=u(keys[9], (4 * hdim,), bound),
        wfc=u(keys[10], (2, 2 * hdim), fc_bound),
        bfc=u(keys[11], (2,), fc_bound),
    )


def prepare_kernel_params(p, dropout):
    """Host-side (free, loop-invariant) weight fusion / layout prep."""
    H = p['h0'].shape[1]
    K = p['wih0'].shape[1]

    def gates_t(w):   # torch (4H, in), gate order [i,f,g,o] -> per-gate (in, H)
        wt = w.T
        return wt[:, 0:H], wt[:, H:2 * H], wt[:, 2 * H:3 * H], wt[:, 3 * H:4 * H]

    i0, f0, g0, o0 = gates_t(p['whh0'])        # h0 -> layer-0 gates
    xi1, xf1, xg1, xo1 = gates_t(p['wih1'])    # h0 (layer-1 input) -> layer-1 gates
    hi1, hf1, hg1, ho1 = gates_t(p['whh1'])    # h1 -> layer-1 gates
    Z = jnp.zeros((H, H), jnp.float32)
    top = jnp.concatenate([i0, xi1, f0, xf1, o0, xo1, g0, xg1], axis=1)
    bot = jnp.concatenate([Z, hi1, Z, hf1, Z, ho1, Z, hg1], axis=1)
    wblk = jnp.concatenate([top, bot], axis=0).astype(jnp.bfloat16)   # (2H, 8H)

    xi0, xf0, xg0, xo0 = gates_t(p['wih0'])
    Zk = jnp.zeros((K, H), jnp.float32)
    wx = jnp.concatenate([xi0, Zk, xf0, Zk, xo0, Zk, xg0, Zk],
                         axis=1).astype(jnp.bfloat16)                 # (K, 8H)

    b0 = p['bih0'] + p['bhh0']
    b1 = p['bih1'] + p['bhh1']

    def split(b):
        return b[0:H], b[H:2 * H], b[2 * H:3 * H], b[3 * H:4 * H]

    b0i, b0f, b0g, b0o = split(b0)
    b1i, b1f, b1g, b1o = split(b1)
    bcomb = jnp.concatenate(
        [b0i, b1i, b0f, b1f, b0o, b1o, b0g, b1g])[None, :].astype(jnp.float32)

    wfc_t = p['wfc'].T.astype(jnp.float32)                            # (2H, 2)
    return dict(
        hc0=p['h0'].reshape(1, 2 * H).astype(jnp.float32),
        cc0=p['c0'].reshape(1, 2 * H).astype(jnp.float32),
        wx=wx, bcomb=bcomb, wblk=wblk,
        wfc_eval=wfc_t * (1.0 - dropout),    # eval dropout scale folded in
        wfc_train=wfc_t,
        bfc=p['bfc'][None, :].astype(jnp.float32),
    )


def rnn_reference(x, p, dropout, stage='eval'):
    """Pure-JAX sequential reference (torch semantics); LSTM weights rounded to
    bf16 to mirror the kernel's weight dtype, activations kept f32."""
    H = p['h0'].shape[1]

    def rd(w):
        return w.astype(jnp.bfloat16).astype(jnp.float32)

    def layer(xs, wih, whh, bih, bhh, h, c):
        wih_t, whh_t = rd(wih).T, rd(whh).T
        b = (bih + bhh)[None, :]
        ys = []
        for t in range(xs.shape[0]):
            g = xs[t:t + 1] @ wih_t + h @ whh_t + b
            i = jax.nn.sigmoid(g[:, 0:H])
            f = jax.nn.sigmoid(g[:, H:2 * H])
            gg = jnp.tanh(g[:, 2 * H:3 * H])
            o = jax.nn.sigmoid(g[:, 3 * H:4 * H])
            c = f * c + i * gg
            h = o * jnp.tanh(c)
            ys.append(h)
        return jnp.concatenate(ys, axis=0), h

    y0, h0f = layer(x, p['wih0'], p['whh0'], p['bih0'], p['bhh0'],
                    p['h0'][0:1], p['c0'][0:1])
    _, h1f = layer(y0, p['wih1'], p['whh1'], p['bih1'], p['bhh1'],
                   p['h0'][1:2], p['c0'][1:2])
    hcat = jnp.concatenate([h0f, h1f], axis=1)
    scale = (1.0 - dropout) if stage != 'train' else 1.0
    out = (hcat * scale) @ p['wfc'].T + p['bfc'][None, :]
    return out[0]


if __name__ == "__main__":
    kdim, rnn_hdim, seq_len, dropout = 32, 32, 8, 0.2

    key = jax.random.PRNGKey(0)
    pkey, xkey = jax.random.split(key)
    raw = init_params(pkey, kdim, rnn_hdim)
    kparams = prepare_kernel_params(raw, dropout)
    x = jax.random.normal(xkey, (seq_len, kdim), jnp.float32)

    y = jax.block_until_ready(rnn_forward(x, kparams, stage='eval'))
    y_ref = rnn_reference(x, raw, dropout, stage='eval')

    assert y.shape == (2,)
    assert bool(jnp.all(jnp.isfinite(y)))
    # bf16 matmul inputs -> loosened tolerance vs the f32-activation reference.
    assert bool(jnp.allclose(y, y_ref, atol=5e-2, rtol=5e-2)), (y, y_ref)

    print("KERNEL_OK")
</pallas_src>

<mosaic_0001>
module attributes {stable_mosaic.version = 11 : i64} {
  func.func @rnn_kernel(%arg0: memref<8x32xf32, #tpu.memory_space<vmem>>, %arg1: memref<1x64xf32, #tpu.memory_space<vmem>>, %arg2: memref<1x64xf32, #tpu.memory_space<vmem>>, %arg3: memref<32x256xbf16, #tpu.memory_space<vmem>>, %arg4: memref<1x256xf32, #tpu.memory_space<vmem>>, %arg5: memref<64x256xbf16, #tpu.memory_space<vmem>>, %arg6: memref<64x2xf32, #tpu.memory_space<vmem>>, %arg7: memref<1x2xf32, #tpu.memory_space<vmem>>, %arg8: memref<1x2xf32, #tpu.memory_space<vmem>>) attributes {dimension_semantics = [], scalar_prefetch = 0 : i64, scratch_operands = 0 : i64, tpu.core_type = #tpu.core_type<tc>} {
    %c0 = arith.constant 0 : index
    %c0_0 = arith.constant 0 : index
    %0 = vector.load %arg5[%c0, %c0_0] : memref<64x256xbf16, #tpu.memory_space<vmem>>, vector<64x256xbf16>
    %c0_1 = arith.constant 0 : index
    %c0_2 = arith.constant 0 : index
    %1 = vector.load %arg4[%c0_1, %c0_2] : memref<1x256xf32, #tpu.memory_space<vmem>>, vector<1x256xf32>
    %c0_3 = arith.constant 0 : index
    %c0_4 = arith.constant 0 : index
    %2 = vector.load %arg0[%c0_3, %c0_4] : memref<8x32xf32, #tpu.memory_space<vmem>>, vector<8x32xf32>
    %3 = arith.truncf %2 : vector<8x32xf32> to vector<8x32xbf16>
    %c0_5 = arith.constant 0 : index
    %c0_6 = arith.constant 0 : index
    %4 = vector.load %arg3[%c0_5, %c0_6] : memref<32x256xbf16, #tpu.memory_space<vmem>>, vector<32x256xbf16>
    %cst = arith.constant dense<0.000000e+00> : vector<8x256xf32>
    %5 = tpu.matmul %3, %4, %cst {dimension_numbers = #tpu.dot_dimension_numbers<[1], [0], [0], [1], [0, 0, 1, 1], [], []>} : vector<8x32xbf16>, vector<32x256xbf16>, vector<8x256xf32> -> vector<8x256xf32>
    %6 = vector.broadcast %1 : vector<1x256xf32> to vector<8x256xf32>
    %7 = arith.addf %5, %6 : vector<8x256xf32>
    %c0_7 = arith.constant 0 : index
    %c0_8 = arith.constant 0 : index
    %8 = vector.load %arg1[%c0_7, %c0_8] : memref<1x64xf32, #tpu.memory_space<vmem>>, vector<1x64xf32>
    %c0_9 = arith.constant 0 : index
    %c0_10 = arith.constant 0 : index
    %9 = vector.load %arg2[%c0_9, %c0_10] : memref<1x64xf32, #tpu.memory_space<vmem>>, vector<1x64xf32>
    %10 = tpu.iota {dimensions = array<i32: 1>} : vector<1x64xi32>
    %c32_i32 = arith.constant 32 : i32
    %11 = vector.broadcast %c32_i32 : i32 to vector<1x64xi32>
    %12 = arith.cmpi slt, %10, %11 : vector<1x64xi32>
    %13 = vector.extract_strided_slice %7 {offsets = [0, 0], sizes = [1, 256], strides = [1, 1]} : vector<8x256xf32> to vector<1x256xf32>
    %14 = arith.truncf %8 : vector<1x64xf32> to vector<1x64xbf16>
    %cst_11 = arith.constant dense<0.000000e+00> : vector<1x256xf32>
    %15 = tpu.matmul %14, %0, %cst_11 {dimension_numbers = #tpu.dot_dimension_numbers<[1], [0], [0], [1], [0, 0, 1, 1], [], []>} : vector<1x64xbf16>, vector<64x256xbf16>, vector<1x256xf32> -> vector<1x256xf32>
    %16 = arith.addf %15, %13 : vector<1x256xf32>
    %17 = vector.extract_strided_slice %16 {offsets = [0, 0], sizes = [1, 64], strides = [1, 1]} : vector<1x256xf32> to vector<1x64xf32>
    %18 = arith.negf %17 : vector<1x64xf32>
    %19 = math.exp %18 : vector<1x64xf32>
    %cst_12 = arith.constant 1.000000e+00 : f32
    %20 = vector.broadcast %cst_12 : f32 to vector<1x64xf32>
    %21 = arith.addf %20, %19 : vector<1x64xf32>
    %22 = arith.divf %20, %21 : vector<1x64xf32>
    %23 = vector.extract_strided_slice %16 {offsets = [0, 64], sizes = [1, 64], strides = [1, 1]} : vector<1x256xf32> to vector<1x64xf32>
    %24 = arith.negf %23 : vector<1x64xf32>
    %25 = math.exp %24 : vector<1x64xf32>
    %cst_13 = arith.constant 1.000000e+00 : f32
    %26 = vector.broadcast %cst_13 : f32 to vector<1x64xf32>
    %27 = arith.addf %26, %25 : vector<1x64xf32>
    %28 = arith.divf %26, %27 : vector<1x64xf32>
    %29 = vector.extract_strided_slice %16 {offsets = [0, 128], sizes = [1, 64], strides = [1, 1]} : vector<1x256xf32> to vector<1x64xf32>
    %30 = arith.negf %29 : vector<1x64xf32>
    %31 = math.exp %30 : vector<1x64xf32>
    %cst_14 = arith.constant 1.000000e+00 : f32
    %32 = vector.broadcast %cst_14 : f32 to vector<1x64xf32>
    %33 = arith.addf %32, %31 : vector<1x64xf32>
    %34 = arith.divf %32, %33 : vector<1x64xf32>
    %35 = vector.extract_strided_slice %16 {offsets = [0, 192], sizes = [1, 64], strides = [1, 1]} : vector<1x256xf32> to vector<1x64xf32>
    %36 = math.tanh %35 : vector<1x64xf32>
    %37 = arith.mulf %28, %9 : vector<1x64xf32>
    %38 = arith.mulf %22, %36 : vector<1x64xf32>
    %39 = arith.addf %37, %38 : vector<1x64xf32>
    %40 = math.tanh %39 : vector<1x64xf32>
    %41 = arith.mulf %34, %40 : vector<1x64xf32>
    %42 = arith.select %12, %41, %8 : vector<1x64xi1>, vector<1x64xf32>
    %43 = arith.select %12, %39, %9 : vector<1x64xi1>, vector<1x64xf32>
    %44 = vector.extract_strided_slice %7 {offsets = [1, 0], sizes = [1, 256], strides = [1, 1]} : vector<8x256xf32> to vector<1x256xf32>
    %45 = arith.truncf %42 : vector<1x64xf32> to vector<1x64xbf16>
    %cst_15 = arith.constant dense<0.000000e+00> : vector<1x256xf32>
    %46 = tpu.matmul %45, %0, %cst_15 {dimension_numbers = #tpu.dot_dimension_numbers<[1], [0], [0], [1], [0, 0, 1, 1], [], []>} : vector<1x64xbf16>, vector<64x256xbf16>, vector<1x256xf32> -> vector<1x256xf32>
    %47 = arith.addf %46, %44 : vector<1x256xf32>
    %48 = vector.extract_strided_slice %47 {offsets = [0, 0], sizes = [1, 64], strides = [1, 1]} : vector<1x256xf32> to vector<1x64xf32>
    %49 = arith.negf %48 : vector<1x64xf32>
    %50 = math.exp %49 : vector<1x64xf32>
    %cst_16 = arith.constant 1.000000e+00 : f32
    %51 = vector.broadcast %cst_16 : f32 to vector<1x64xf32>
    %52 = arith.addf %51, %50 : vector<1x64xf32>
    %53 = arith.divf %51, %52 : vector<1x64xf32>
    %54 = vector.extract_strided_slice %47 {offsets = [0, 64], sizes = [1, 64], strides = [1, 1]} : vector<1x256xf32> to vector<1x64xf32>
    %55 = arith.negf %54 : vector<1x64xf32>
    %56 = math.exp %55 : vector<1x64xf32>
    %cst_17 = arith.constant 1.000000e+00 : f32
    %57 = vector.broadcast %cst_17 : f32 to vector<1x64xf32>
    %58 = arith.addf %57, %56 : vector<1x64xf32>
    %59 = arith.divf %57, %58 : vector<1x64xf32>
    %60 = vector.extract_strided_slice %47 {offsets = [0, 128], sizes = [1, 64], strides = [1, 1]} : vector<1x256xf32> to vector<1x64xf32>
    %61 = arith.negf %60 : vector<1x64xf32>
    %62 = math.exp %61 : vector<1x64xf32>
    %cst_18 = arith.constant 1.000000e+00 : f32
    %63 = vector.broadcast %cst_18 : f32 to vector<1x64xf32>
    %64 = arith.addf %63, %62 : vector<1x64xf32>
    %65 = arith.divf %63, %64 : vector<1x64xf32>
    %66 = vector.extract_strided_slice %47 {offsets = [0, 192], sizes = [1, 64], strides = [1, 1]} : vector<1x256xf32> to vector<1x64xf32>
    %67 = math.tanh %66 : vector<1x64xf32>
    %68 = arith.mulf %59, %43 : vector<1x64xf32>
    %69 = arith.mulf %53, %67 : vector<1x64xf32>
    %70 = arith.addf %68, %69 : vector<1x64xf32>
    %71 = math.tanh %70 : vector<1x64xf32>
    %72 = arith.mulf %65, %71 : vector<1x64xf32>
    %73 = vector.extract_strided_slice %7 {offsets = [2, 0], sizes = [1, 256], strides = [1, 1]} : vector<8x256xf32> to vector<1x256xf32>
    %74 = arith.truncf %72 : vector<1x64xf32> to vector<1x64xbf16>
    %cst_19 = arith.constant dense<0.000000e+00> : vector<1x256xf32>
    %75 = tpu.matmul %74, %0, %cst_19 {dimension_numbers = #tpu.dot_dimension_numbers<[1], [0], [0], [1], [0, 0, 1, 1], [], []>} : vector<1x64xbf16>, vector<64x256xbf16>, vector<1x256xf32> -> vector<1x256xf32>
    %76 = arith.addf %75, %73 : vector<1x256xf32>
    %77 = vector.extract_strided_slice %76 {offsets = [0, 0], sizes = [1, 64], strides = [1, 1]} : vector<1x256xf32> to vector<1x64xf32>
    %78 = arith.negf %77 : vector<1x64xf32>
    %79 = math.exp %78 : vector<1x64xf32>
    %cst_20 = arith.constant 1.000000e+00 : f32
    %80 = vector.broadcast %cst_20 : f32 to vector<1x64xf32>
    %81 = arith.addf %80, %79 : vector<1x64xf32>
    %82 = arith.divf %80, %81 : vector<1x64xf32>
    %83 = vector.extract_strided_slice %76 {offsets = [0, 64], sizes = [1, 64], strides = [1, 1]} : vector<1x256xf32> to vector<1x64xf32>
    %84 = arith.negf %83 : vector<1x64xf32>
    %85 = math.exp %84 : vector<1x64xf32>
    %cst_21 = arith.constant 1.000000e+00 : f32
    %86 = vector.broadcast %cst_21 : f32 to vector<1x64xf32>
    %87 = arith.addf %86, %85 : vector<1x64xf32>
    %88 = arith.divf %86, %87 : vector<1x64xf32>
    %89 = vector.extract_strided_slice %76 {offsets = [0, 128], sizes = [1, 64], strides = [1, 1]} : vector<1x256xf32> to vector<1x64xf32>
    %90 = arith.negf %89 : vector<1x64xf32>
    %91 = math.exp %90 : vector<1x64xf32>
    %cst_22 = arith.constant 1.000000e+00 : f32
    %92 = vector.broadcast %cst_22 : f32 to vector<1x64xf32>
    %93 = arith.addf %92, %91 : vector<1x64xf32>
    %94 = arith.divf %92, %93 : vector<1x64xf32>
    %95 = vector.extract_strided_slice %76 {offsets = [0, 192], sizes = [1, 64], strides = [1, 1]} : vector<1x256xf32> to vector<1x64xf32>
    %96 = math.tanh %95 : vector<1x64xf32>
    %97 = arith.mulf %88, %70 : vector<1x64xf32>
    %98 = arith.mulf %82, %96 : vector<1x64xf32>
    %99 = arith.addf %97, %98 : vector<1x64xf32>
    %100 = math.tanh %99 : vector<1x64xf32>
    %101 = arith.mulf %94, %100 : vector<1x64xf32>
    %102 = vector.extract_strided_slice %7 {offsets = [3, 0], sizes = [1, 256], strides = [1, 1]} : vector<8x256xf32> to vector<1x256xf32>
    %103 = arith.truncf %101 : vector<1x64xf32> to vector<1x64xbf16>
    %cst_23 = arith.constant dense<0.000000e+00> : vector<1x256xf32>
    %104 = tpu.matmul %103, %0, %cst_23 {dimension_numbers = #tpu.dot_dimension_numbers<[1], [0], [0], [1], [0, 0, 1, 1], [], []>} : vector<1x64xbf16>, vector<64x256xbf16>, vector<1x256xf32> -> vector<1x256xf32>
    %105 = arith.addf %104, %102 : vector<1x256xf32>
    %106 = vector.extract_strided_slice %105 {offsets = [0, 0], sizes = [1, 64], strides = [1, 1]} : vector<1x256xf32> to vector<1x64xf32>
    %107 = arith.negf %106 : vector<1x64xf32>
    %108 = math.exp %107 : vector<1x64xf32>
    %cst_24 = arith.constant 1.000000e+00 : f32
    %109 = vector.broadcast %cst_24 : f32 to vector<1x64xf32>
    %110 = arith.addf %109, %108 : vector<1x64xf32>
    %111 = arith.divf %109, %110 : vector<1x64xf32>
    %112 = vector.extract_strided_slice %105 {offsets = [0, 64], sizes = [1, 64], strides = [1, 1]} : vector<1x256xf32> to vector<1x64xf32>
    %113 = arith.negf %112 : vector<1x64xf32>
    %114 = math.exp %113 : vector<1x64xf32>
    %cst_25 = arith.constant 1.000000e+00 : f32
    %115 = vector.broadcast %cst_25 : f32 to vector<1x64xf32>
    %116 = arith.addf %115, %114 : vector<1x64xf32>
    %117 = arith.divf %115, %116 : vector<1x64xf32>
    %118 = vector.extract_strided_slice %105 {offsets = [0, 128], sizes = [1, 64], strides = [1, 1]} : vector<1x256xf32> to vector<1x64xf32>
    %119 = arith.negf %118 : vector<1x64xf32>
    %120 = math.exp %119 : vector<1x64xf32>
    %cst_26 = arith.constant 1.000000e+00 : f32
    %121 = vector.broadcast %cst_26 : f32 to vector<1x64xf32>
    %122 = arith.addf %121, %120 : vector<1x64xf32>
    %123 = arith.divf %121, %122 : vector<1x64xf32>
    %124 = vector.extract_strided_slice %105 {offsets = [0, 192], sizes = [1, 64], strides = [1, 1]} : vector<1x256xf32> to vector<1x64xf32>
    %125 = math.tanh %124 : vector<1x64xf32>
    %126 = arith.mulf %117, %99 : vector<1x64xf32>
    %127 = arith.mulf %111, %125 : vector<1x64xf32>
    %128 = arith.addf %126, %127 : vector<1x64xf32>
    %129 = math.tanh %128 : vector<1x64xf32>
    %130 = arith.mulf %123, %129 : vector<1x64xf32>
    %131 = vector.extract_strided_slice %7 {offsets = [4, 0], sizes = [1, 256], strides = [1, 1]} : vector<8x256xf32> to vector<1x256xf32>
    %132 = arith.truncf %130 : vector<1x64xf32> to vector<1x64xbf16>
    %cst_27 = arith.constant dense<0.000000e+00> : vector<1x256xf32>
    %133 = tpu.matmul %132, %0, %cst_27 {dimension_numbers = #tpu.dot_dimension_numbers<[1], [0], [0], [1], [0, 0, 1, 1], [], []>} : vector<1x64xbf16>, vector<64x256xbf16>, vector<1x256xf32> -> vector<1x256xf32>
    %134 = arith.addf %133, %131 : vector<1x256xf32>
    %135 = vector.extract_strided_slice %134 {offsets = [0, 0], sizes = [1, 64], strides = [1, 1]} : vector<1x256xf32> to vector<1x64xf32>
    %136 = arith.negf %135 : vector<1x64xf32>
    %137 = math.exp %136 : vector<1x64xf32>
    %cst_28 = arith.constant 1.000000e+00 : f32
    %138 = vector.broadcast %cst_28 : f32 to vector<1x64xf32>
    %139 = arith.addf %138, %137 : vector<1x64xf32>
    %140 = arith.divf %138, %139 : vector<1x64xf32>
    %141 = vector.extract_strided_slice %134 {offsets = [0, 64], sizes = [1, 64], strides = [1, 1]} : vector<1x256xf32> to vector<1x64xf32>
    %142 = arith.negf %141 : vector<1x64xf32>
    %143 = math.exp %142 : vector<1x64xf32>
    %cst_29 = arith.constant 1.000000e+00 : f32
    %144 = vector.broadcast %cst_29 : f32 to vector<1x64xf32>
    %145 = arith.addf %144, %143 : vector<1x64xf32>
    %146 = arith.divf %144, %145 : vector<1x64xf32>
    %147 = vector.extract_strided_slice %134 {offsets = [0, 128], sizes = [1, 64], strides = [1, 1]} : vector<1x256xf32> to vector<1x64xf32>
    %148 = arith.negf %147 : vector<1x64xf32>
    %149 = math.exp %148 : vector<1x64xf32>
    %cst_30 = arith.constant 1.000000e+00 : f32
    %150 = vector.broadcast %cst_30 : f32 to vector<1x64xf32>
    %151 = arith.addf %150, %149 : vector<1x64xf32>
    %152 = arith.divf %150, %151 : vector<1x64xf32>
    %153 = vector.extract_strided_slice %134 {offsets = [0, 192], sizes = [1, 64], strides = [1, 1]} : vector<1x256xf32> to vector<1x64xf32>
    %154 = math.tanh %153 : vector<1x64xf32>
    %155 = arith.mulf %146, %128 : vector<1x64xf32>
    %156 = arith.mulf %140, %154 : vector<1x64xf32>
    %157 = arith.addf %155, %156 : vector<1x64xf32>
    %158 = math.tanh %157 : vector<1x64xf32>
    %159 = arith.mulf %152, %158 : vector<1x64xf32>
    %160 = vector.extract_strided_slice %7 {offsets = [5, 0], sizes = [1, 256], strides = [1, 1]} : vector<8x256xf32> to vector<1x256xf32>
    %161 = arith.truncf %159 : vector<1x64xf32> to vector<1x64xbf16>
    %cst_31 = arith.constant dense<0.000000e+00> : vector<1x256xf32>
    %162 = tpu.matmul %161, %0, %cst_31 {dimension_numbers = #tpu.dot_dimension_numbers<[1], [0], [0], [1], [0, 0, 1, 1], [], []>} : vector<1x64xbf16>, vector<64x256xbf16>, vector<1x256xf32> -> vector<1x256xf32>
    %163 = arith.addf %162, %160 : vector<1x256xf32>
    %164 = vector.extract_strided_slice %163 {offsets = [0, 0], sizes = [1, 64], strides = [1, 1]} : vector<1x256xf32> to vector<1x64xf32>
    %165 = arith.negf %164 : vector<1x64xf32>
    %166 = math.exp %165 : vector<1x64xf32>
    %cst_32 = arith.constant 1.000000e+00 : f32
    %167 = vector.broadcast %cst_32 : f32 to vector<1x64xf32>
    %168 = arith.addf %167, %166 : vector<1x64xf32>
    %169 = arith.divf %167, %168 : vector<1x64xf32>
    %170 = vector.extract_strided_slice %163 {offsets = [0, 64], sizes = [1, 64], strides = [1, 1]} : vector<1x256xf32> to vector<1x64xf32>
    %171 = arith.negf %170 : vector<1x64xf32>
    %172 = math.exp %171 : vector<1x64xf32>
    %cst_33 = arith.constant 1.000000e+00 : f32
    %173 = vector.broadcast %cst_33 : f32 to vector<1x64xf32>
    %174 = arith.addf %173, %172 : vector<1x64xf32>
    %175 = arith.divf %173, %174 : vector<1x64xf32>
    %176 = vector.extract_strided_slice %163 {offsets = [0, 128], sizes = [1, 64], strides = [1, 1]} : vector<1x256xf32> to vector<1x64xf32>
    %177 = arith.negf %176 : vector<1x64xf32>
    %178 = math.exp %177 : vector<1x64xf32>
    %cst_34 = arith.constant 1.000000e+00 : f32
    %179 = vector.broadcast %cst_34 : f32 to vector<1x64xf32>
    %180 = arith.addf %179, %178 : vector<1x64xf32>
    %181 = arith.divf %179, %180 : vector<1x64xf32>
    %182 = vector.extract_strided_slice %163 {offsets = [0, 192], sizes = [1, 64], strides = [1, 1]} : vector<1x256xf32> to vector<1x64xf32>
    %183 = math.tanh %182 : vector<1x64xf32>
    %184 = arith.mulf %175, %157 : vector<1x64xf32>
    %185 = arith.mulf %169, %183 : vector<1x64xf32>
    %186 = arith.addf %184, %185 : vector<1x64xf32>
    %187 = math.tanh %186 : vector<1x64xf32>
    %188 = arith.mulf %181, %187 : vector<1x64xf32>
    %189 = vector.extract_strided_slice %7 {offsets = [6, 0], sizes = [1, 256], strides = [1, 1]} : vector<8x256xf32> to vector<1x256xf32>
    %190 = arith.truncf %188 : vector<1x64xf32> to vector<1x64xbf16>
    %cst_35 = arith.constant dense<0.000000e+00> : vector<1x256xf32>
    %191 = tpu.matmul %190, %0, %cst_35 {dimension_numbers = #tpu.dot_dimension_numbers<[1], [0], [0], [1], [0, 0, 1, 1], [], []>} : vector<1x64xbf16>, vector<64x256xbf16>, vector<1x256xf32> -> vector<1x256xf32>
    %192 = arith.addf %191, %189 : vector<1x256xf32>
    %193 = vector.extract_strided_slice %192 {offsets = [0, 0], sizes = [1, 64], strides = [1, 1]} : vector<1x256xf32> to vector<1x64xf32>
    %194 = arith.negf %193 : vector<1x64xf32>
    %195 = math.exp %194 : vector<1x64xf32>
    %cst_36 = arith.constant 1.000000e+00 : f32
    %196 = vector.broadcast %cst_36 : f32 to vector<1x64xf32>
    %197 = arith.addf %196, %195 : vector<1x64xf32>
    %198 = arith.divf %196, %197 : vector<1x64xf32>
    %199 = vector.extract_strided_slice %192 {offsets = [0, 64], sizes = [1, 64], strides = [1, 1]} : vector<1x256xf32> to vector<1x64xf32>
    %200 = arith.negf %199 : vector<1x64xf32>
    %201 = math.exp %200 : vector<1x64xf32>
    %cst_37 = arith.constant 1.000000e+00 : f32
    %202 = vector.broadcast %cst_37 : f32 to vector<1x64xf32>
    %203 = arith.addf %202, %201 : vector<1x64xf32>
    %204 = arith.divf %202, %203 : vector<1x64xf32>
    %205 = vector.extract_strided_slice %192 {offsets = [0, 128], sizes = [1, 64], strides = [1, 1]} : vector<1x256xf32> to vector<1x64xf32>
    %206 = arith.negf %205 : vector<1x64xf32>
    %207 = math.exp %206 : vector<1x64xf32>
    %cst_38 = arith.constant 1.000000e+00 : f32
    %208 = vector.broadcast %cst_38 : f32 to vector<1x64xf32>
    %209 = arith.addf %208, %207 : vector<1x64xf32>
    %210 = arith.divf %208, %209 : vector<1x64xf32>
    %211 = vector.extract_strided_slice %192 {offsets = [0, 192], sizes = [1, 64], strides = [1, 1]} : vector<1x256xf32> to vector<1x64xf32>
    %212 = math.tanh %211 : vector<1x64xf32>
    %213 = arith.mulf %204, %186 : vector<1x64xf32>
    %214 = arith.mulf %198, %212 : vector<1x64xf32>
    %215 = arith.addf %213, %214 : vector<1x64xf32>
    %216 = math.tanh %215 : vector<1x64xf32>
    %217 = arith.mulf %210, %216 : vector<1x64xf32>
    %218 = vector.extract_strided_slice %7 {offsets = [7, 0], sizes = [1, 256], strides = [1, 1]} : vector<8x256xf32> to vector<1x256xf32>
    %219 = arith.truncf %217 : vector<1x64xf32> to vector<1x64xbf16>
    %cst_39 = arith.constant dense<0.000000e+00> : vector<1x256xf32>
    %220 = tpu.matmul %219, %0, %cst_39 {dimension_numbers = #tpu.dot_dimension_numbers<[1], [0], [0], [1], [0, 0, 1, 1], [], []>} : vector<1x64xbf16>, vector<64x256xbf16>, vector<1x256xf32> -> vector<1x256xf32>
    %221 = arith.addf %220, %218 : vector<1x256xf32>
    %222 = vector.extract_strided_slice %221 {offsets = [0, 0], sizes = [1, 64], strides = [1, 1]} : vector<1x256xf32> to vector<1x64xf32>
    %223 = arith.negf %222 : vector<1x64xf32>
    %224 = math.exp %223 : vector<1x64xf32>
    %cst_40 = arith.constant 1.000000e+00 : f32
    %225 = vector.broadcast %cst_40 : f32 to vector<1x64xf32>
    %226 = arith.addf %225, %224 : vector<1x64xf32>
    %227 = arith.divf %225, %226 : vector<1x64xf32>
    %228 = vector.extract_strided_slice %221 {offsets = [0, 64], sizes = [1, 64], strides = [1, 1]} : vector<1x256xf32> to vector<1x64xf32>
    %229 = arith.negf %228 : vector<1x64xf32>
    %230 = math.exp %229 : vector<1x64xf32>
    %cst_41 = arith.constant 1.000000e+00 : f32
    %231 = vector.broadcast %cst_41 : f32 to vector<1x64xf32>
    %232 = arith.addf %231, %230 : vector<1x64xf32>
    %233 = arith.divf %231, %232 : vector<1x64xf32>
    %234 = vector.extract_strided_slice %221 {offsets = [0, 128], sizes = [1, 64], strides = [1, 1]} : vector<1x256xf32> to vector<1x64xf32>
    %235 = arith.negf %234 : vector<1x64xf32>
    %236 = math.exp %235 : vector<1x64xf32>
    %cst_42 = arith.constant 1.000000e+00 : f32
    %237 = vector.broadcast %cst_42 : f32 to vector<1x64xf32>
    %238 = arith.addf %237, %236 : vector<1x64xf32>
    %239 = arith.divf %237, %238 : vector<1x64xf32>
    %240 = vector.extract_strided_slice %221 {offsets = [0, 192], sizes = [1, 64], strides = [1, 1]} : vector<1x256xf32> to vector<1x64xf32>
    %241 = math.tanh %240 : vector<1x64xf32>
    %242 = arith.mulf %233, %215 : vector<1x64xf32>
    %243 = arith.mulf %227, %241 : vector<1x64xf32>
    %244 = arith.addf %242, %243 : vector<1x64xf32>
    %245 = math.tanh %244 : vector<1x64xf32>
    %246 = arith.mulf %239, %245 : vector<1x64xf32>
    %247 = arith.truncf %246 : vector<1x64xf32> to vector<1x64xbf16>
    %cst_43 = arith.constant dense<0.000000e+00> : vector<1x256xf32>
    %248 = tpu.matmul %247, %0, %cst_43 {dimension_numbers = #tpu.dot_dimension_numbers<[1], [0], [0], [1], [0, 0, 1, 1], [], []>} : vector<1x64xbf16>, vector<64x256xbf16>, vector<1x256xf32> -> vector<1x256xf32>
    %249 = arith.addf %248, %1 : vector<1x256xf32>
    %250 = vector.extract_strided_slice %249 {offsets = [0, 32], sizes = [1, 32], strides = [1, 1]} : vector<1x256xf32> to vector<1x32xf32>
    %251 = arith.negf %250 : vector<1x32xf32>
    %252 = math.exp %251 : vector<1x32xf32>
    %cst_44 = arith.constant 1.000000e+00 : f32
    %253 = vector.broadcast %cst_44 : f32 to vector<1x32xf32>
    %254 = arith.addf %253, %252 : vector<1x32xf32>
    %255 = arith.divf %253, %254 : vector<1x32xf32>
    %256 = vector.extract_strided_slice %249 {offsets = [0, 96], sizes = [1, 32], strides = [1, 1]} : vector<1x256xf32> to vector<1x32xf32>
    %257 = arith.negf %256 : vector<1x32xf32>
    %258 = math.exp %257 : vector<1x32xf32>
    %cst_45 = arith.constant 1.000000e+00 : f32
    %259 = vector.broadcast %cst_45 : f32 to vector<1x32xf32>
    %260 = arith.addf %259, %258 : vector<1x32xf32>
    %261 = arith.divf %259, %260 : vector<1x32xf32>
    %262 = vector.extract_strided_slice %249 {offsets = [0, 160], sizes = [1, 32], strides = [1, 1]} : vector<1x256xf32> to vector<1x32xf32>
    %263 = arith.negf %262 : vector<1x32xf32>
    %264 = math.exp %263 : vector<1x32xf32>
    %cst_46 = arith.constant 1.000000e+00 : f32
    %265 = vector.broadcast %cst_46 : f32 to vector<1x32xf32>
    %266 = arith.addf %265, %264 : vector<1x32xf32>
    %267 = arith.divf %265, %266 : vector<1x32xf32>
    %268 = vector.extract_strided_slice %249 {offsets = [0, 224], sizes = [1, 32], strides = [1, 1]} : vector<1x256xf32> to vector<1x32xf32>
    %269 = math.tanh %268 : vector<1x32xf32>
    %270 = vector.extract_strided_slice %244 {offsets = [0, 32], sizes = [1, 32], strides = [1, 1]} : vector<1x64xf32> to vector<1x32xf32>
    %271 = arith.mulf %261, %270 : vector<1x32xf32>
    %272 = arith.mulf %255, %269 : vector<1x32xf32>
    %273 = arith.addf %271, %272 : vector<1x32xf32>
    %274 = math.tanh %273 : vector<1x32xf32>
    %275 = arith.mulf %267, %274 : vector<1x32xf32>
    %c0_47 = arith.constant 0 : index
    %c0_48 = arith.constant 0 : index
    %276 = vector.load %arg6[%c0_47, %c0_48] : memref<64x2xf32, #tpu.memory_space<vmem>>, vector<64x2xf32>
    %277 = vector.extract_strided_slice %246 {offsets = [0, 0], sizes = [1, 32], strides = [1, 1]} : vector<1x64xf32> to vector<1x32xf32>
    %278 = vector.extract_strided_slice %276 {offsets = [0, 0], sizes = [32, 2], strides = [1, 1]} : vector<64x2xf32> to vector<32x2xf32>
    %cst_49 = arith.constant dense<0.000000e+00> : vector<1x2xf32>
    %279 = tpu.matmul %277, %278, %cst_49 {dimension_numbers = #tpu.dot_dimension_numbers<[1], [0], [0], [1], [0, 0, 1, 1], [], []>} : vector<1x32xf32>, vector<32x2xf32>, vector<1x2xf32> -> vector<1x2xf32>
    %280 = vector.extract_strided_slice %276 {offsets = [32, 0], sizes = [32, 2], strides = [1, 1]} : vector<64x2xf32> to vector<32x2xf32>
    %cst_50 = arith.constant dense<0.000000e+00> : vector<1x2xf32>
    %281 = tpu.matmul %275, %280, %cst_50 {dimension_numbers = #tpu.dot_dimension_numbers<[1], [0], [0], [1], [0, 0, 1, 1], [], []>} : vector<1x32xf32>, vector<32x2xf32>, vector<1x2xf32> -> vector<1x2xf32>
    %282 = arith.addf %279, %281 : vector<1x2xf32>
    %c0_51 = arith.constant 0 : index
    %c0_52 = arith.constant 0 : index
    %283 = vector.load %arg7[%c0_51, %c0_52] : memref<1x2xf32, #tpu.memory_space<vmem>>, vector<1x2xf32>
    %284 = arith.addf %282, %283 : vector<1x2xf32>
    %c0_53 = arith.constant 0 : index
    %c0_54 = arith.constant 0 : index
    %285 = vector.load %arg8[%c0_53, %c0_54] : memref<1x2xf32, #tpu.memory_space<vmem>>, vector<1x2xf32>
    tpu.vector_store %arg8[%c0_53, %c0_54], %284 {strides = array<i32>} : memref<1x2xf32, #tpu.memory_space<vmem>>, vector<1x2xf32>,
    return
  }
}

</mosaic_0001>

<bundles_post_ra>
// kernel: tpu_custom_call.1
= control target key start
LH: loop header
LB: loop body
LE: loop exit
PB: predicated region body
PF: predicated region fallthrough
CT: control target
= control target key end

     0   :  { %13 = vsyncpa [#allocation3], 0  ;;  %s1672_s0 = inlined_call_operand.vmem [shape: f32[8,32], index: 0, kind: input, shape index: {}]   ;;  %s1673_s1 = inlined_call_operand.vmem [shape: f32[1,64], index: 1, kind: input, shape index: {}]   ;;  %s1674_s2 = inlined_call_operand.vmem [shape: f32[1,64], index: 2, kind: input, shape index: {}]   ;;  %s1675_s3 = inlined_call_operand.hbm [shape: bf16[32,256], index: 3, kind: input, shape index: {}]   ;;  %s1676_s4 = inlined_call_operand.vmem [shape: f32[1,256], index: 4, kind: input, shape index: {}]   ;;  %s1677_s5 = inlined_call_operand.vmem [shape: bf16[64,256], index: 5, kind: input, shape index: {}]   ;;  %s1678_s6 = inlined_call_operand.vmem [shape: f32[64,2], index: 6, kind: input, shape index: {}]   ;;  %s1679_s7 = inlined_call_operand.vmem [shape: f32[1,2], index: 7, kind: input, shape index: {}]   ;;  %s1680_s8 = inlined_call_operand.hbm [shape: f32[1,2], index: 8, kind: output, shape index: {}]  }
   0x1   :  { %14 = vsyncpa [#allocation4], 0  ;;  %s1350_s27 = smov [#allocation2]   ;;  %s1302_s9 = scalar_lea.hbm %s1675_s3, 512 }
   0x2   :  { %s26_s28 = sshll.u32 %s1350_s27, 4  ;;  %p1303_p0 = scmp.ne.s32.totalorder %s1675_s3, %s1302_s9  ;;  %s27_s28 = int_to_ptr.vmem [resolvable:$true] %s26_s28 }
   0x3   :  { %p1306_p1 = scmp.lt.u32.totalorder %s1302_s9, %s1675_s3 }
   0x5   :  { %p1308_p2 = pnand %p1306_p1, %p1303_p0 }
   0x7   :  { %1311 = shalt.err (!%p1308_p2)
}
   0x8   :  { %s1312_s14 = scalar_lea.vmem %s27_s28, 512  ;;  %p1317_p4 = scmp.lt.s32.totalorder %s27_s28, %s27_s28 }
   0x9   :  { %p1313_p3 = scmp.ne.s32.totalorder %s27_s28, %s1312_s14  ;;  %p1318_p5 = scmp.lt.s32.totalorder %s1312_s14, %s1312_s14 }
   0xb   :  { %p1319_p6 = por %p1318_p5, %p1317_p4 }
   0xd   :  { %p1320_p7 = pnand %p1319_p6, %p1313_p3 }
   0xf   :  { %1323 = shalt.err (!%p1320_p7)
}
  0x10   :  { %s1351_s15 = smov 128   ;;  %s1352_s16 = smov 8  }
  0x11   :  { %32 = dma.hbm_to_vmem [thread:$0]  %s1675_s3, 512, %s27_s28, [#allocation3], %s1351_s15, %s1351_s15, %s1352_s16  }
  0x12   :  { %1346 = dma.done.wait [#allocation3], 512  }
  0x13   :  { %1347 = vsyncadd [#allocation3], 4294966784  ;;  %v1353_v0 = vmov 0   ;;  %v1422_v1 = vld [vmem:[%s1677_s5 + $0x4] ss:$8 sps:$4 sm:$0xff]   ;;  %vm91_vm0 = vcmask 261120   ;;  %v61_v17 = vlaneseq }
  0x14   :  { %127 = vmatprep.mubr.bf16.mxu0 %v1353_v0  ;;  %218 = vmatprep.mubr.bf16.mxu1 %v1353_v0  ;;  %v1427_v2 = vld [vmem:[%s1677_s5] ss:$8 sps:$4 sm:$0xff]   ;;  %v1179_v3 = vld [vmem:[#allocation2 + $0x4] ss:$8 sps:$4 sm:$0xff]   ;;  %v1434_v5 = vld [vmem:[%s1677_s5 + $0x14] ss:$8 sps:$4 sm:$0xff]  }
  0x15   :  { %186 = vmatprep.subr.bf16.mxu1 %v1422_v1  ;;  %v1181_v4 = vld [vmem:[#allocation2] ss:$8 sps:$4 sm:$0xff]   ;;  %v1439_v6 = vld [vmem:[%s1677_s5 + $0x10] ss:$8 sps:$4 sm:$0xff]   ;;  %95 = vmatprep.subr.bf16.mxu0 %v1179_v3  ;;  %v1185_v7 = vld [vmem:[#allocation2 + $0x14] ss:$8 sps:$4 sm:$0xff]  }
  0x16   :  { %187 = vmatpush1.bf16.msra.mxu1 %v1427_v2  ;;  %96 = vmatpush1.bf16.msra.mxu0 %v1181_v4  ;;  %v1187_v8 = vld [vmem:[#allocation2 + $0x10] ss:$8 sps:$4 sm:$0xff]   ;;  %v1445_v9 = vld [vmem:[%s1677_s5 + $0x24] ss:$8 sps:$4 sm:$0xff]   ;;  %v1454_v11 = vld [vmem:[%s1677_s5 + $0x20] ss:$8 sps:$4 sm:$0xff]  }
  0x17   :  { %188 = vmatprep.subr.bf16.mxu1 %v1434_v5  ;;  %97 = vmatprep.subr.bf16.mxu0 %v1185_v7  ;;  %v54_v10 = vld [vmem:[%s1672_s0] sm:$0xff]  ;;  %v1460_v13 = vld [vmem:[%s1677_s5 + $0x34] ss:$8 sps:$4 sm:$0xff]   ;;  %v1467_v14 = vld [vmem:[%s1677_s5 + $0x30] ss:$8 sps:$4 sm:$0xff]   ;;  %vm182_vm1 = vcmask 523264  }
  0x18   :  { %v55_v12 = vpack.c.bf16 %v54_v10, %v54_v10  ;;  %v1472_v15 = vld [vmem:[%s1673_s1] sm:$0x1]  ;;  %v62_v18 = vshrl.u32 %v61_v17, 7  ;;  %s1354_s16 = smov 64   ;;  %v139_v52 = vand.u32 127, %v61_v17  ;;  %vm1356_vm3 = vmmov 0  }
  0x19   :  { %v141_v16 = vpack.c.bf16 %v1472_v15, %v1472_v15  ;;  %v53_v20 = vld [vmem:[%s1676_s4] sm:$0x3]  ;;  %s1358_s23 = smov 96   ;;  %vm1063_vm4 = vcmask 8192  }
  0x1a   :  { %189 = vmatpush1.bf16.msra.mxu1 %v1439_v6  ;;  %98 = vmatpush1.bf16.msra.mxu0 %v1187_v8  ;;  %v63_v19 = vsub.s32 0, %v62_v18  ;;  %v67_v21 = vsub.s32 1, %v62_v18  ;;  %v137_v36 = vld [vmem:[%s1674_s2] sm:$0x1]  ;;  %vm140_vm2 = vcmp.lt.s32.totalorder %v139_v52, 32 }
  0x1b   :  { %190 = vmatprep.subr.bf16.mxu1 %v1445_v9  ;;  %281 = vmatprep.subr.bf16.mxu0 %v1422_v1 }
  0x1c   :  { %v1502_v22 = vrot.slane %v53_v20, %v63_v19  ;;  %v1504_v24 = vrot.slane %v53_v20, %v67_v21  ;;  %v244_v38 = vrot.slane %v137_v36, %v63_v19 }
  0x1d   :  { %1084 = vmatmul.mubr.msk.bf16.vlgmr.msra.gmra.mrb[0].mxu0 %vm91_vm0, %v55_v12 }
  0x1e   :  { %191 = vmatpush1.bf16.msra.mxu1 %v1454_v11  ;;  %282 = vmatpush1.bf16.msra.mxu0 %v1427_v2 }
  0x1f   :  { %192 = vmatprep.subr.bf16.mxu1 %v1460_v13  ;;  %313 = vmatprep.mubr.bf16.mxu0 %v1353_v0 }
  0x20   :  { %283 = vmatprep.subr.bf16.mxu0 %v1434_v5 }
  0x22   :  { %193 = vmatpush1.bf16.msra.mxu1 %v1467_v14  ;;  %284 = vmatpush1.bf16.msra.mxu0 %v1439_v6 }
  0x23   :  { %364 = vmatprep.subr.bf16.mxu1 %v1422_v1  ;;  %285 = vmatprep.subr.bf16.mxu0 %v1445_v9 }
  0x25   :  { %1093 = vmatmul.mubr.msk.bf16.vlgmr.msra.gmra.mrb[0].mxu1 %vm182_vm1, %v141_v16 }
  0x26   :  { %365 = vmatpush1.bf16.msra.mxu1 %v1427_v2  ;;  %396 = vmatprep.mubr.bf16.mxu1 %v1353_v0 }
  0x27   :  { %366 = vmatprep.subr.bf16.mxu1 %v1434_v5  ;;  %286 = vmatpush1.bf16.msra.mxu0 %v1454_v11 }
  0x28   :  { %287 = vmatprep.subr.bf16.mxu0 %v1460_v13 }
  0x2a   :  { %367 = vmatpush1.bf16.msra.mxu1 %v1439_v6 }
  0x2b   :  { %368 = vmatprep.subr.bf16.mxu1 %v1445_v9  ;;  %288 = vmatpush1.bf16.msra.mxu0 %v1467_v14 }
  0x2c   :  { %443 = vmatprep.subr.bf16.mxu0 %v1422_v1 }
  0x2e   :  { %369 = vmatpush1.bf16.msra.mxu1 %v1454_v11 }
  0x2f   :  { %370 = vmatprep.subr.bf16.mxu1 %v1460_v13 }
  0x32   :  { %371 = vmatpush1.bf16.msra.mxu1 %v1467_v14 }
  0x33   :  { %522 = vmatprep.subr.bf16.mxu1 %v1422_v1 }
  0xf0   :  { %v129_v23 = vpop.f32.mrb[0].mxu0 }
  0xf1   :  { %v131_v25 = vpop.f32.mrb[1].mxu0  ;;  %v1507_v27 = vadd.f32 %v129_v23, %v1502_v22 }
  0xf2   :  { %v133_v26 = vpop.f32.mrb[2].mxu0  ;;  %v1510_v29 = vadd.f32 %v131_v25, %v1504_v24 }
  0xf3   :  { %v134_v28 = vpop.f32.mrb[3].mxu0  ;;  %v274_v61 = vrot.slane %v1507_v27, 1 }
  0xf4   :  { %v275_v63 = vrot.slane %v1510_v29, 1 }
  0xf8   :  { %v220_v30 = vpop.f32.mrb[0].mxu1 }
  0xf9   :  { %v221_v31 = vadd.f32 %v220_v30, %v1507_v27  ;;  %v222_v32 = vpop.f32.mrb[1].mxu1 }
  0xfa   :  { %v223_v33 = vadd.f32 %v222_v32, %v1510_v29  ;;  %v224_v34 = vpop.f32.mrb[2].mxu1 }
  0xfb   :  { %v225_v35 = vpop.f32.mrb[3].mxu1  ;;  %v1094_v39 = vmul.f32 -1.442695, %v221_v31 }
  0xfc   :  { %1194 = vtanh.f32 %v223_v33  ;;  %v1095_v50 = vmul.f32 -1.442695, %v223_v33 }
  0xfd   :  { %1196 = vpow2.f32 %v1094_v39  ;;  %v358_v39 = vrot.slane %v1510_v29, 2 }
 0x106   :  { %v1195_v37 = vpop.eup %1194 }
 0x107   :  { %250 = vrot.lane.b32.xlu0 %v1195_v37, %s1354_s16  ;;  %v1197_v40 = vpop.eup %1196  ;;  %v357_v37 = vrot.slane %v1507_v27, 2 }
 0x108   :  { %v230_v41 = vadd.f32 1.0, %v1197_v40 }
 0x10a   :  { %1198 = vrcp.f32 %v230_v41 }
 0x10b   :  { %245 = vrot.lane.b32.xlu0 %v244_v38, %s1354_s16 }
 0x114   :  { %v1199_v42 = vpop.eup %1198 }
 0x179   :  { %v251_v43 = vpop.permute.xlu0 %250 }
 0x17a   :  { %v253_v44 = vmul.f32 %v1199_v42, %v251_v43 }
 0x17c   :  { %255 = vrot.lane.b32.xlu1 %v253_v44, %s1354_s16 }
 0x17d   :  { %v246_v45 = vpop.permute.xlu0 %245 }
 0x17e   :  { %v248_v46 = vmul.f32 %v1199_v42, %v246_v45 }
 0x1ee   :  { %v256_v47 = vpop.permute.xlu1 %255 }
 0x1ef   :  { %v258_v48 = vadd.f32 %v256_v47, %v248_v46 }
 0x1f1   :  { %1200 = vtanh.f32 %v258_v48  ;;  %267 = vrot.lane.b32.xlu0 %v258_v48, %s1354_s16 }
 0x1f2   :  { %1202 = vpow2.f32 %v1095_v50 }
 0x1fb   :  { %v1201_v49 = vpop.eup %1200 }
 0x1fc   :  { %261 = vrot.lane.b32.xlu1 %v1201_v49, %s1354_s16  ;;  %v1203_v51 = vpop.eup %1202 }
 0x1fd   :  { %v236_v53 = vadd.f32 1.0, %v1203_v51 }
 0x1ff   :  { %1204 = vrcp.f32 %v236_v53 }
 0x209   :  { %v1205_v56 = vpop.eup %1204 }
 0x263   :  { %v268_v54 = vpop.permute.xlu0 %267 }
 0x264   :  { %v270_v55 = vsel %vm140_vm2, %v268_v54, %v137_v36 }
 0x265   :  { %336 = vrot.lane.b32.xlu0 %v270_v55, %s1354_s16 }
 0x26e   :  { %v262_v57 = vpop.permute.xlu1 %261 }
 0x26f   :  { %v264_v58 = vmul.f32 %v1205_v56, %v262_v57 }
 0x271   :  { %v265_v59 = vsel %vm140_vm2, %v264_v58, %v1472_v15 }
 0x272   :  { %v271_v60 = vpack.c.bf16 %v265_v59, %v265_v59 }
 0x274   :  { %1096 = vmatmul.mubr.msk.bf16.vlgmr.msra.gmra.mrb[4].mxu0 %vm182_vm1, %v271_v60 }
 0x275   :  { %444 = vmatpush1.bf16.msra.mxu0 %v1427_v2  ;;  %475 = vmatprep.mubr.bf16.mxu0 %v1353_v0 }
 0x276   :  { %445 = vmatprep.subr.bf16.mxu0 %v1434_v5 }
 0x279   :  { %446 = vmatpush1.bf16.msra.mxu0 %v1439_v6 }
 0x27a   :  { %447 = vmatprep.subr.bf16.mxu0 %v1445_v9 }
 0x27d   :  { %448 = vmatpush1.bf16.msra.mxu0 %v1454_v11 }
 0x27e   :  { %449 = vmatprep.subr.bf16.mxu0 %v1460_v13 }
 0x281   :  { %450 = vmatpush1.bf16.msra.mxu0 %v1467_v14 }
 0x282   :  { %601 = vmatprep.subr.bf16.mxu0 %v1422_v1 }
 0x2d7   :  { %v337_v21 = vpop.permute.xlu0 %336 }
 0x347   :  { %v315_v62 = vpop.f32.mrb[4].mxu0 }
 0x348   :  { %v316_v3 = vadd.f32 %v315_v62, %v274_v61  ;;  %v317_v4 = vpop.f32.mrb[5].mxu0 }
 0x349   :  { %v318_v7 = vadd.f32 %v317_v4, %v275_v63  ;;  %v319_v8 = vpop.f32.mrb[6].mxu0  ;;  %v436_v63 = vrot.slane %v1507_v27, 3  ;;  %v437_v4 = vrot.slane %v1510_v29, 3 }
 0x34a   :  { %v320_v10 = vpop.f32.mrb[7].mxu0  ;;  %v1097_v15 = vmul.f32 -1.442695, %v316_v3 }
 0x34b   :  { %1206 = vtanh.f32 %v318_v7  ;;  %v1098_v30 = vmul.f32 -1.442695, %v318_v7 }
 0x34c   :  { %1208 = vpow2.f32 %v1097_v15 }
 0x355   :  { %v1207_v12 = vpop.eup %1206 }
 0x356   :  { %341 = vrot.lane.b32.xlu1 %v1207_v12, %s1354_s16  ;;  %v1209_v16 = vpop.eup %1208 }
 0x357   :  { %v325_v17 = vadd.f32 1.0, %v1209_v16 }
 0x359   :  { %1210 = vrcp.f32 %v325_v17 }
 0x363   :  { %v1211_v18 = vpop.eup %1210 }
 0x364   :  { %v339_v23 = vmul.f32 %v1211_v18, %v337_v21 }
 0x3c8   :  { %v342_v19 = vpop.permute.xlu1 %341 }
 0x3c9   :  { %v344_v20 = vmul.f32 %v1211_v18, %v342_v19 }
 0x3cb   :  { %346 = vrot.lane.b32.xlu1 %v344_v20, %s1354_s16 }
 0x43d   :  { %v347_v25 = vpop.permute.xlu1 %346 }
 0x43e   :  { %v349_v26 = vadd.f32 %v347_v25, %v339_v23 }
 0x440   :  { %1212 = vtanh.f32 %v349_v26 }
 0x441   :  { %1214 = vpow2.f32 %v1098_v30 }
 0x44a   :  { %v1213_v28 = vpop.eup %1212 }
 0x44b   :  { %352 = vrot.lane.b32.xlu0 %v1213_v28, %s1354_s16  ;;  %v1215_v31 = vpop.eup %1214 }
 0x44c   :  { %v331_v32 = vadd.f32 1.0, %v1215_v31 }
 0x44e   :  { %1216 = vrcp.f32 %v331_v32 }
 0x458   :  { %v1217_v33 = vpop.eup %1216 }
 0x4bd   :  { %v353_v34 = vpop.permute.xlu0 %352 }
 0x4be   :  { %v355_v35 = vmul.f32 %v1217_v33, %v353_v34 }
 0x4c0   :  { %v356_v36 = vpack.c.bf16 %v355_v35, %v355_v35 }
 0x4c2   :  { %1099 = vmatmul.mubr.msk.bf16.vlgmr.msra.gmra.mrb[4].mxu1 %vm182_vm1, %v356_v36 }
 0x4c3   :  { %523 = vmatpush1.bf16.msra.mxu1 %v1427_v2  ;;  %554 = vmatprep.mubr.bf16.mxu1 %v1353_v0 }
 0x4c4   :  { %524 = vmatprep.subr.bf16.mxu1 %v1434_v5 }
 0x4c7   :  { %525 = vmatpush1.bf16.msra.mxu1 %v1439_v6 }
 0x4c8   :  { %526 = vmatprep.subr.bf16.mxu1 %v1445_v9 }
 0x4cb   :  { %527 = vmatpush1.bf16.msra.mxu1 %v1454_v11 }
 0x4cc   :  { %528 = vmatprep.subr.bf16.mxu1 %v1460_v13 }
 0x4cf   :  { %529 = vmatpush1.bf16.msra.mxu1 %v1467_v14 }
 0x4d0   :  { %680 = vmatprep.subr.bf16.mxu1 %v1422_v1 }
 0x595   :  { %v398_v38 = vpop.f32.mrb[4].mxu1 }
 0x596   :  { %v399_v40 = vadd.f32 %v398_v38, %v357_v37  ;;  %v400_v41 = vpop.f32.mrb[5].mxu1  ;;  %v515_v38 = vrot.slane %v1507_v27, 4 }
 0x597   :  { %v401_v42 = vadd.f32 %v400_v41, %v358_v39  ;;  %v402_v43 = vpop.f32.mrb[6].mxu1 }
 0x598   :  { %v403_v44 = vpop.f32.mrb[7].mxu1  ;;  %v1100_v46 = vmul.f32 -1.442695, %v399_v40  ;;  %v516_v40 = vrot.slane %v1510_v29, 4 }
 0x599   :  { %1218 = vtanh.f32 %v401_v42  ;;  %v1101_v56 = vmul.f32 -1.442695, %v401_v42 }
 0x59a   :  { %1220 = vpow2.f32 %v1100_v46 }
 0x5a3   :  { %v1219_v45 = vpop.eup %1218 }
 0x5a4   :  { %420 = vrot.lane.b32.xlu1 %v1219_v45, %s1354_s16  ;;  %v1221_v47 = vpop.eup %1220 }
 0x5a5   :  { %v408_v48 = vadd.f32 1.0, %v1221_v47 }
 0x5a7   :  { %1222 = vrcp.f32 %v408_v48 }
 0x5b1   :  { %v1223_v49 = vpop.eup %1222 }
 0x5b2   :  { %v418_v52 = vmul.f32 %v1223_v49, %v349_v26 }
 0x616   :  { %v421_v50 = vpop.permute.xlu1 %420 }
 0x617   :  { %v423_v51 = vmul.f32 %v1223_v49, %v421_v50 }
 0x619   :  { %425 = vrot.lane.b32.xlu0 %v423_v51, %s1354_s16 }
 0x68b   :  { %v426_v53 = vpop.permute.xlu0 %425 }
 0x68c   :  { %v428_v54 = vadd.f32 %v426_v53, %v418_v52 }
 0x68e   :  { %1224 = vtanh.f32 %v428_v54 }
 0x68f   :  { %1226 = vpow2.f32 %v1101_v56 }
 0x698   :  { %v1225_v55 = vpop.eup %1224 }
 0x699   :  { %431 = vrot.lane.b32.xlu1 %v1225_v55, %s1354_s16  ;;  %v1227_v57 = vpop.eup %1226 }
 0x69a   :  { %v414_v58 = vadd.f32 1.0, %v1227_v57 }
 0x69c   :  { %1228 = vrcp.f32 %v414_v58 }
 0x6a6   :  { %v1229_v59 = vpop.eup %1228 }
 0x70b   :  { %v432_v60 = vpop.permute.xlu1 %431 }
 0x70c   :  { %v434_v61 = vmul.f32 %v1229_v59, %v432_v60 }
 0x70e   :  { %v435_v62 = vpack.c.bf16 %v434_v61, %v434_v61 }
 0x710   :  { %1102 = vmatmul.mubr.msk.bf16.vlgmr.msra.gmra.mrb[8].mxu0 %vm182_vm1, %v435_v62 }
 0x711   :  { %602 = vmatpush1.bf16.msra.mxu0 %v1427_v2  ;;  %633 = vmatprep.mubr.bf16.mxu0 %v1353_v0 }
 0x712   :  { %603 = vmatprep.subr.bf16.mxu0 %v1434_v5 }
 0x715   :  { %604 = vmatpush1.bf16.msra.mxu0 %v1439_v6 }
 0x716   :  { %605 = vmatprep.subr.bf16.mxu0 %v1445_v9 }
 0x719   :  { %606 = vmatpush1.bf16.msra.mxu0 %v1454_v11 }
 0x71a   :  { %607 = vmatprep.subr.bf16.mxu0 %v1460_v13 }
 0x71d   :  { %608 = vmatpush1.bf16.msra.mxu0 %v1467_v14 }
 0x71e   :  { %759 = vmatprep.subr.bf16.mxu0 %v1422_v1 }
 0x7e3   :  { %v477_v3 = vpop.f32.mrb[8].mxu0 }
 0x7e4   :  { %v478_v7 = vadd.f32 %v477_v3, %v436_v63  ;;  %v479_v8 = vpop.f32.mrb[9].mxu0  ;;  %v594_v63 = vrot.slane %v1507_v27, 5 }
 0x7e5   :  { %v480_v10 = vadd.f32 %v479_v8, %v437_v4  ;;  %v481_v12 = vpop.f32.mrb[10].mxu0  ;;  %v595_v4 = vrot.slane %v1510_v29, 5 }
 0x7e6   :  { %v482_v15 = vpop.f32.mrb[11].mxu0  ;;  %v1103_v17 = vmul.f32 -1.442695, %v478_v7 }
 0x7e7   :  { %1230 = vtanh.f32 %v480_v10  ;;  %v1104_v31 = vmul.f32 -1.442695, %v480_v10 }
 0x7e8   :  { %1232 = vpow2.f32 %v1103_v17 }
 0x7f1   :  { %v1231_v16 = vpop.eup %1230 }
 0x7f2   :  { %499 = vrot.lane.b32.xlu0 %v1231_v16, %s1354_s16  ;;  %v1233_v18 = vpop.eup %1232 }
 0x7f3   :  { %v487_v19 = vadd.f32 1.0, %v1233_v18 }
 0x7f5   :  { %1234 = vrcp.f32 %v487_v19 }
 0x7ff   :  { %v1235_v20 = vpop.eup %1234 }
 0x800   :  { %v497_v25 = vmul.f32 %v1235_v20, %v428_v54 }
 0x864   :  { %v500_v21 = vpop.permute.xlu0 %499 }
 0x865   :  { %v502_v23 = vmul.f32 %v1235_v20, %v500_v21 }
 0x867   :  { %504 = vrot.lane.b32.xlu1 %v502_v23, %s1354_s16 }
 0x8d9   :  { %v505_v26 = vpop.permute.xlu1 %504 }
 0x8da   :  { %v507_v28 = vadd.f32 %v505_v26, %v497_v25 }
 0x8dc   :  { %1236 = vtanh.f32 %v507_v28 }
 0x8dd   :  { %1238 = vpow2.f32 %v1104_v31 }
 0x8e6   :  { %v1237_v30 = vpop.eup %1236 }
 0x8e7   :  { %510 = vrot.lane.b32.xlu0 %v1237_v30, %s1354_s16  ;;  %v1239_v32 = vpop.eup %1238 }
 0x8e8   :  { %v493_v33 = vadd.f32 1.0, %v1239_v32 }
 0x8ea   :  { %1240 = vrcp.f32 %v493_v33 }
 0x8f4   :  { %v1241_v34 = vpop.eup %1240 }
 0x959   :  { %v511_v35 = vpop.permute.xlu0 %510 }
 0x95a   :  { %v513_v36 = vmul.f32 %v1241_v34, %v511_v35 }
 0x95c   :  { %v514_v37 = vpack.c.bf16 %v513_v36, %v513_v36 }
 0x95e   :  { %1105 = vmatmul.mubr.msk.bf16.vlgmr.msra.gmra.mrb[8].mxu1 %vm182_vm1, %v514_v37 }
 0x95f   :  { %681 = vmatpush1.bf16.msra.mxu1 %v1427_v2  ;;  %712 = vmatprep.mubr.bf16.mxu1 %v1353_v0 }
 0x960   :  { %682 = vmatprep.subr.bf16.mxu1 %v1434_v5 }
 0x963   :  { %683 = vmatpush1.bf16.msra.mxu1 %v1439_v6 }
 0x964   :  { %684 = vmatprep.subr.bf16.mxu1 %v1445_v9 }
 0x967   :  { %685 = vmatpush1.bf16.msra.mxu1 %v1454_v11 }
 0x968   :  { %686 = vmatprep.subr.bf16.mxu1 %v1460_v13 }
 0x96b   :  { %687 = vmatpush1.bf16.msra.mxu1 %v1467_v14 }
 0x96c   :  { %834 = vmatprep.subr.bf16.mxu1 %v1422_v1 }
 0xa31   :  { %v556_v39 = vpop.f32.mrb[8].mxu1 }
 0xa32   :  { %v557_v41 = vadd.f32 %v556_v39, %v515_v38  ;;  %v558_v42 = vpop.f32.mrb[9].mxu1  ;;  %v673_v38 = vrot.slane %v1507_v27, 6 }
 0xa33   :  { %v559_v43 = vadd.f32 %v558_v42, %v516_v40  ;;  %v560_v44 = vpop.f32.mrb[10].mxu1  ;;  %v674_v40 = vrot.slane %v1510_v29, 6 }
 0xa34   :  { %v561_v45 = vpop.f32.mrb[11].mxu1  ;;  %v1106_v47 = vmul.f32 -1.442695, %v557_v41 }
 0xa35   :  { %1242 = vtanh.f32 %v559_v43  ;;  %v1107_v56 = vmul.f32 -1.442695, %v559_v43 }
 0xa36   :  { %1244 = vpow2.f32 %v1106_v47 }
 0xa3f   :  { %v1243_v46 = vpop.eup %1242 }
 0xa40   :  { %578 = vrot.lane.b32.xlu1 %v1243_v46, %s1354_s16  ;;  %v1245_v48 = vpop.eup %1244 }
 0xa41   :  { %v566_v49 = vadd.f32 1.0, %v1245_v48 }
 0xa43   :  { %1246 = vrcp.f32 %v566_v49 }
 0xa4d   :  { %v1247_v1 = vpop.eup %1246 }
 0xa4e   :  { %v576_v52 = vmul.f32 %v1247_v1, %v507_v28 }
 0xab2   :  { %v579_v50 = vpop.permute.xlu1 %578 }
 0xab3   :  { %v581_v51 = vmul.f32 %v1247_v1, %v579_v50 }
 0xab5   :  { %583 = vrot.lane.b32.xlu0 %v581_v51, %s1354_s16 }
 0xb27   :  { %v584_v53 = vpop.permute.xlu0 %583 }
 0xb28   :  { %v586_v54 = vadd.f32 %v584_v53, %v576_v52 }
 0xb2a   :  { %1248 = vtanh.f32 %v586_v54 }
 0xb2b   :  { %1250 = vpow2.f32 %v1107_v56 }
 0xb34   :  { %v1249_v55 = vpop.eup %1248 }
 0xb35   :  { %589 = vrot.lane.b32.xlu1 %v1249_v55, %s1354_s16  ;;  %v1251_v57 = vpop.eup %1250  ;;  %v752_v55 = vrot.slane %v1507_v27, 7 }
 0xb36   :  { %v572_v58 = vadd.f32 1.0, %v1251_v57  ;;  %v753_v57 = vrot.slane %v1510_v29, 7 }
 0xb38   :  { %1252 = vrcp.f32 %v572_v58 }
 0xb42   :  { %v1253_v59 = vpop.eup %1252 }
 0xba7   :  { %v590_v60 = vpop.permute.xlu1 %589 }
 0xba8   :  { %v592_v61 = vmul.f32 %v1253_v59, %v590_v60 }
 0xbaa   :  { %v593_v62 = vpack.c.bf16 %v592_v61, %v592_v61 }
 0xbac   :  { %1108 = vmatmul.mubr.msk.bf16.vlgmr.msra.gmra.mrb[12].mxu0 %vm182_vm1, %v593_v62 }
 0xbad   :  { %760 = vmatpush1.bf16.msra.mxu0 %v1427_v2  ;;  %791 = vmatprep.mubr.bf16.mxu0 %v1353_v0 }
 0xbae   :  { %761 = vmatprep.subr.bf16.mxu0 %v1434_v5 }
 0xbb1   :  { %762 = vmatpush1.bf16.msra.mxu0 %v1439_v6 }
 0xbb2   :  { %763 = vmatprep.subr.bf16.mxu0 %v1445_v9 }
 0xbb5   :  { %764 = vmatpush1.bf16.msra.mxu0 %v1454_v11 }
 0xbb6   :  { %765 = vmatprep.subr.bf16.mxu0 %v1460_v13 }
 0xbb9   :  { %766 = vmatpush1.bf16.msra.mxu0 %v1467_v14 }
 0xc7f   :  { %v635_v3 = vpop.f32.mrb[12].mxu0 }
 0xc80   :  { %v636_v7 = vadd.f32 %v635_v3, %v594_v63  ;;  %v637_v8 = vpop.f32.mrb[13].mxu0 }
 0xc81   :  { %v638_v10 = vadd.f32 %v637_v8, %v595_v4  ;;  %v639_v12 = vpop.f32.mrb[14].mxu0 }
 0xc82   :  { %v640_v15 = vpop.f32.mrb[15].mxu0  ;;  %v1109_v17 = vmul.f32 -1.442695, %v636_v7 }
 0xc83   :  { %1254 = vtanh.f32 %v638_v10  ;;  %v1110_v31 = vmul.f32 -1.442695, %v638_v10 }
 0xc84   :  { %1256 = vpow2.f32 %v1109_v17 }
 0xc8d   :  { %v1255_v16 = vpop.eup %1254 }
 0xc8e   :  { %657 = vrot.lane.b32.xlu0 %v1255_v16, %s1354_s16  ;;  %v1257_v18 = vpop.eup %1256 }
 0xc8f   :  { %v645_v19 = vadd.f32 1.0, %v1257_v18 }
 0xc91   :  { %1258 = vrcp.f32 %v645_v19 }
 0xc9b   :  { %v1259_v20 = vpop.eup %1258 }
 0xc9c   :  { %v655_v25 = vmul.f32 %v1259_v20, %v586_v54 }
 0xd00   :  { %v658_v21 = vpop.permute.xlu0 %657 }
 0xd01   :  { %v660_v23 = vmul.f32 %v1259_v20, %v658_v21 }
 0xd03   :  { %662 = vrot.lane.b32.xlu1 %v660_v23, %s1354_s16 }
 0xd75   :  { %v663_v26 = vpop.permute.xlu1 %662 }
 0xd76   :  { %v665_v28 = vadd.f32 %v663_v26, %v655_v25 }
 0xd78   :  { %1260 = vtanh.f32 %v665_v28 }
 0xd79   :  { %1262 = vpow2.f32 %v1110_v31 }
 0xd82   :  { %v1261_v30 = vpop.eup %1260 }
 0xd83   :  { %668 = vrot.lane.b32.xlu0 %v1261_v30, %s1354_s16  ;;  %v1263_v32 = vpop.eup %1262 }
 0xd84   :  { %v651_v33 = vadd.f32 1.0, %v1263_v32 }
 0xd86   :  { %1264 = vrcp.f32 %v651_v33 }
 0xd90   :  { %v1265_v34 = vpop.eup %1264 }
 0xdf5   :  { %v669_v35 = vpop.permute.xlu0 %668 }
 0xdf6   :  { %v671_v36 = vmul.f32 %v1265_v34, %v669_v35 }
 0xdf8   :  { %v672_v37 = vpack.c.bf16 %v671_v36, %v671_v36 }
 0xdfa   :  { %1111 = vmatmul.mubr.msk.bf16.vlgmr.msra.gmra.mrb[12].mxu1 %vm182_vm1, %v672_v37 }
 0xdfb   :  { %835 = vmatpush1.bf16.msra.mxu1 %v1427_v2  ;;  %866 = vmatprep.mubr.bf16.mxu1 %v1353_v0 }
 0xdfc   :  { %836 = vmatprep.subr.bf16.mxu1 %v1434_v5 }
 0xdff   :  { %837 = vmatpush1.bf16.msra.mxu1 %v1439_v6 }
 0xe00   :  { %838 = vmatprep.subr.bf16.mxu1 %v1445_v9 }
 0xe03   :  { %839 = vmatpush1.bf16.msra.mxu1 %v1454_v11 }
 0xe04   :  { %840 = vmatprep.subr.bf16.mxu1 %v1460_v13 }
 0xe07   :  { %841 = vmatpush1.bf16.msra.mxu1 %v1467_v14 }
 0xecd   :  { %v714_v39 = vpop.f32.mrb[12].mxu1 }
 0xece   :  { %v715_v2 = vadd.f32 %v714_v39, %v673_v38  ;;  %v716_v41 = vpop.f32.mrb[13].mxu1 }
 0xecf   :  { %v717_v0 = vadd.f32 %v716_v41, %v674_v40  ;;  %v718_v42 = vpop.f32.mrb[14].mxu1 }
 0xed0   :  { %v719_v5 = vpop.f32.mrb[15].mxu1  ;;  %v1112_v9 = vmul.f32 -1.442695, %v715_v2  ;;  %v911_v42 = vld [vmem:[%s1678_s6 + $0x30] sm:$0xff] }
 0xed1   :  { %1266 = vtanh.f32 %v717_v0  ;;  %v1113_v49 = vmul.f32 -1.442695, %v717_v0  ;;  %v909_v0 = vld [vmem:[%s1678_s6 + $0x20] sm:$0xff]  ;;  %v1355_v5 = vmov 0.0|0.0  }
 0xed2   :  { %1268 = vpow2.f32 %v1112_v9  ;;  %1154 = vmatprep.subr.bf16.mxu0 %v1355_v5  ;;  %v912_v9 = vld [vmem:[%s1678_s6 + $0x38] sm:$0xff] }
 0xedb   :  { %v1267_v6 = vpop.eup %1266 }
 0xedc   :  { %736 = vrot.lane.b32.xlu1 %v1267_v6, %s1354_s16  ;;  %v1269_v11 = vpop.eup %1268 }
 0xedd   :  { %v724_v13 = vadd.f32 1.0, %v1269_v11  ;;  %v1357_v11 = vmov 0.0  }
 0xedf   :  { %1270 = vrcp.f32 %v724_v13  ;;  %v1158_v13 = vpack.c.bf16 %v912_v9, %v911_v42 }
 0xee9   :  { %v1271_v14 = vpop.eup %1270 }
 0xeea   :  { %v734_v45 = vmul.f32 %v1271_v14, %v665_v28 }
 0xf4e   :  { %v737_v43 = vpop.permute.xlu1 %736 }
 0xf4f   :  { %v739_v44 = vmul.f32 %v1271_v14, %v737_v43 }
 0xf51   :  { %741 = vrot.lane.b32.xlu0 %v739_v44, %s1354_s16 }
 0xfc3   :  { %v742_v46 = vpop.permute.xlu0 %741 }
 0xfc4   :  { %v744_v47 = vadd.f32 %v742_v46, %v734_v45 }
 0xfc6   :  { %1272 = vtanh.f32 %v744_v47 }
 0xfc7   :  { %1274 = vpow2.f32 %v1113_v49  ;;  %v905_v49 = vld [vmem:[%s1678_s6] sm:$0xff] }
 0xfd0   :  { %v1273_v48 = vpop.eup %1272 }
 0xfd1   :  { %747 = vrot.lane.b32.xlu1 %v1273_v48, %s1354_s16  ;;  %v1275_v1 = vpop.eup %1274 }
 0xfd2   :  { %v730_v50 = vadd.f32 1.0, %v1275_v1  ;;  %v906_v1 = vld [vmem:[%s1678_s6 + $0x8] sm:$0xff] }
 0xfd4   :  { %1276 = vrcp.f32 %v730_v50  ;;  %v1161_v50 = vpack.c.bf16 %v906_v1, %v905_v49 }
 0xfde   :  { %v1277_v51 = vpop.eup %1276 }
0x1043   :  { %v748_v52 = vpop.permute.xlu1 %747 }
0x1044   :  { %v750_v53 = vmul.f32 %v1277_v51, %v748_v52  ;;  %v907_v51 = vld [vmem:[%s1678_s6 + $0x10] sm:$0xff]  ;;  %v908_v52 = vld [vmem:[%s1678_s6 + $0x18] sm:$0xff] }
0x1046   :  { %v751_v54 = vpack.c.bf16 %v750_v53, %v750_v53 }
0x1048   :  { %1114 = vmatmul.mubr.msk.bf16.vlgmr.msra.gmra.mrb[16].mxu0 %vm182_vm1, %v751_v54  ;;  %v1164_v54 = vpack.c.bf16 %v908_v52, %v907_v51 }
0x1049   :  { %1140 = vmatprep.mubr.msk.f32.mxu0 %vm1356_vm3, %v1357_v11 }
0x111b   :  { %v793_v56 = vpop.f32.mrb[16].mxu0 }
0x111c   :  { %v794_v58 = vadd.f32 %v793_v56, %v752_v55  ;;  %v795_v59 = vpop.f32.mrb[17].mxu0 }
0x111d   :  { %v796_v60 = vadd.f32 %v795_v59, %v753_v57  ;;  %v797_v61 = vpop.f32.mrb[18].mxu0 }
0x111e   :  { %v798_v62 = vpop.f32.mrb[19].mxu0  ;;  %v1115_v3 = vmul.f32 -1.442695, %v794_v58  ;;  %v1061_v58 = vld [vmem:[%s1679_s7] sm:$0x1] }
0x111f   :  { %1278 = vtanh.f32 %v796_v60  ;;  %v1116_v17 = vmul.f32 -1.442695, %v796_v60 }
0x1120   :  { %1280 = vpow2.f32 %v1115_v3 }
0x1129   :  { %v1279_v63 = vpop.eup %1278 }
0x112a   :  { %815 = vrot.lane.b32.xlu0 %v1279_v63, %s1354_s16  ;;  %v1281_v4 = vpop.eup %1280 }
0x112b   :  { %v803_v7 = vadd.f32 1.0, %v1281_v4 }
0x112d   :  { %1282 = vrcp.f32 %v803_v7 }
0x1137   :  { %v1283_v8 = vpop.eup %1282 }
0x1138   :  { %v813_v29 = vmul.f32 %v1283_v8, %v744_v47 }
0x119c   :  { %v816_v10 = vpop.permute.xlu0 %815 }
0x119d   :  { %v818_v27 = vmul.f32 %v1283_v8, %v816_v10 }
0x119f   :  { %820 = vrot.lane.b32.xlu1 %v818_v27, %s1354_s16 }
0x1211   :  { %v821_v12 = vpop.permute.xlu1 %820 }
0x1212   :  { %v823_v15 = vadd.f32 %v821_v12, %v813_v29 }
0x1214   :  { %1284 = vtanh.f32 %v823_v15 }
0x1215   :  { %1286 = vpow2.f32 %v1116_v17 }
0x121e   :  { %v1285_v16 = vpop.eup %1284 }
0x121f   :  { %826 = vrot.lane.b32.xlu0 %v1285_v16, %s1354_s16  ;;  %v1287_v18 = vpop.eup %1286 }
0x1220   :  { %v809_v19 = vadd.f32 1.0, %v1287_v18 }
0x1222   :  { %1288 = vrcp.f32 %v809_v19 }
0x122c   :  { %v1289_v20 = vpop.eup %1288 }
0x1291   :  { %v827_v21 = vpop.permute.xlu0 %826 }
0x1292   :  { %v1618_v23 = vmul.f32 %v1289_v20, %v827_v21 }
0x1294   :  { %v830_v25 = vpack.c.bf16 %v1618_v23, %v1618_v23 }
0x1296   :  { %1117 = vmatmul.mubr.msk.bf16.vlgmr.msra.gmra.mrb[16].mxu1 %vm182_vm1, %v830_v25 }
0x1369   :  { %v868_v26 = vpop.f32.mrb[16].mxu1 }
0x136a   :  { %v870_v28 = vpop.f32.mrb[17].mxu1  ;;  %v869_v34 = vadd.f32 %v868_v26, %v1502_v22  ;;  %v910_v22 = vld [vmem:[%s1678_s6 + $0x28] sm:$0xff]  ;;  %s1359_s6 = smov [#allocation5]  }
0x136b   :  { %v871_v30 = vadd.f32 %v870_v28, %v1504_v24  ;;  %v872_v31 = vpop.f32.mrb[18].mxu1  ;;  %v1155_v6 = vpack.c.bf16 %v910_v22, %v909_v0  ;;  %s1071_s0 = sshll.u32 %s1359_s6, 4  ;;  %s1072_s0 = int_to_ptr.vmem [resolvable:$true] %s1071_s0 }
0x136c   :  { %v873_v32 = vpop.f32.mrb[19].mxu1  ;;  %v1118_v35 = vmul.f32 -1.442695, %v869_v34  ;;  %s1324_s12 = scalar_lea.vmem %s1072_s0, 16  ;;  %s1328_s13 = scalar_lea.vmem %s1072_s0, 32 }
0x136d   :  { %1290 = vtanh.f32 %v871_v30  ;;  %1156 = vmatpush3.bf16.msra.mxu0 %v1155_v6  ;;  %v1119_v43 = vmul.f32 -1.442695, %v871_v30  ;;  %p1325_p8 = scmp.ne.s32.totalorder %s1072_s0, %s1324_s12  ;;  %p1329_p9 = scmp.lt.s32.totalorder %s1072_s0, %s1072_s0 }
0x136e   :  { %1292 = vpow2.f32 %v1118_v35  ;;  %1157 = vmatprep.subr.bf16.mxu0 %v1355_v5  ;;  %p1330_p10 = scmp.lt.s32.totalorder %s1328_s13, %s1324_s12 }
0x1370   :  { %p1331_p11 = por %p1330_p10, %p1329_p9 }
0x1371   :  { %1159 = vmatpush3.bf16.msra.mxu0 %v1158_v13 }
0x1372   :  { %1160 = vmatprep.subr.bf16.mxu0 %v1355_v5  ;;  %p1332_p12 = pnand %p1331_p11, %p1325_p8 }
0x1377   :  { %v1291_v33 = vpop.eup %1290 }
0x1378   :  { %890 = vrot.lane.b32.xlu1 %v1291_v33, %s1354_s16  ;;  %v1293_v36 = vpop.eup %1292 }
0x1379   :  { %v878_v37 = vadd.f32 1.0, %v1293_v36 }
0x137b   :  { %1294 = vrcp.f32 %v878_v37 }
0x1385   :  { %v1295_v38 = vpop.eup %1294 }
0x1386   :  { %v888_v2 = vmul.f32 %v1295_v38, %v823_v15 }
0x13ea   :  { %v891_v39 = vpop.permute.xlu1 %890 }
0x13eb   :  { %v893_v40 = vmul.f32 %v1295_v38, %v891_v39 }
0x13ed   :  { %895 = vrot.lane.b32.xlu0 %v893_v40, %s1354_s16 }
0x145f   :  { %v896_v24 = vpop.permute.xlu0 %895 }
0x1460   :  { %v898_v41 = vadd.f32 %v896_v24, %v888_v2 }
0x1462   :  { %1296 = vtanh.f32 %v898_v41 }
0x1463   :  { %1298 = vpow2.f32 %v1119_v43 }
0x146c   :  { %v1297_v14 = vpop.eup %1296 }
0x146d   :  { %901 = vrot.lane.b32.xlu1 %v1297_v14, %s1354_s16  ;;  %v1299_v44 = vpop.eup %1298 }
0x146e   :  { %v884_v45 = vadd.f32 1.0, %v1299_v44 }
0x1470   :  { %1300 = vrcp.f32 %v884_v45 }
0x147a   :  { %v1301_v46 = vpop.eup %1300 }
0x14df   :  { %v902_v47 = vpop.permute.xlu1 %901 }
0x14e0   :  { %v904_v48 = vmul.f32 %v1301_v46, %v902_v47 }
0x14e2   :  { %914 = vrot.lane.b32.xlu0 %v904_v48, %s1358_s23 }
0x1554   :  { %v915_v53 = vpop.permute.xlu0 %914 }
0x1555   :  { %1141 = vmatmul.mubr.msk.f32.vlgmr.msra.gmra.mrb[20].mxu0 %vm91_vm0, %v915_v53 }
0x1556   :  { %1162 = vmatpush3.bf16.msra.mxu0 %v1161_v50  ;;  %1151 = vmatprep.mubr.msk.f32.mxu0 %vm1356_vm3, %v1357_v11 }
0x1557   :  { %1163 = vmatprep.subr.bf16.mxu0 %v1355_v5 }
0x155a   :  { %1165 = vmatpush3.bf16.msra.mxu0 %v1164_v54 }
0x155d   :  { %1152 = vmatmul.mubr.msk.f32.vlgmr.msra.gmra.mrb[22].mxu0 %vm91_vm0, %v1618_v23 }
0x1628   :  { %v984_v55 = vpop.f32.mrb[20].mxu0 }
0x1629   :  { %v1142_v56 = vpop.f32.mrb[21].mxu0 }
0x1630   :  { %v1057_v57 = vpop.f32.mrb[22].mxu0 }
0x1631   :  { %v1058_v59 = vadd.f32 %v1057_v57, %v984_v55  ;;  %v1153_v60 = vpop.f32.mrb[23].mxu0 }
0x1633   :  { %v1062_v61 = vadd.f32 %v1061_v58, %v1058_v59 }
0x1635   :  { %1064 = vst.msk [vmem:[#allocation5] sm:$0x1] %vm1063_vm4, %v1062_v61 }
0x1636   :  { %1335 = shalt.err (!%p1332_p12)
}
0x1637   :  { %s1336_s7 = scalar_lea.hbm %s1680_s8, 16 }
0x1638   :  { %p1337_p13 = scmp.ne.s32.totalorder %s1680_s8, %s1336_s7  ;;  %p1340_p0 = scmp.lt.u32.totalorder %s1336_s7, %s1680_s8 }
0x163a   :  { %p1342_p1 = pnand %p1340_p0, %p1337_p13 }
0x163c   :  { %1345 = shalt.err (!%p1342_p1)
}
0x163d   :  { %1074 = dma.vmem_to_hbm [thread:$0]  %s1072_s0, 16, %s1680_s8, [#allocation4]  }
0x163e   :  { %1348 = dma.done.wait [#allocation4], 16  }
0x163f   :  { %1349 = vsyncadd [#allocation4], 4294967280 }
0x1640   :  { %1078 = vsyncpa [#allocation3], 1 }
0x1641   :  { %1079 = vsyncpa [#allocation4], 1 }

</bundles_post_ra>
